<compile_context>
chip_gen: v7x
topology: tpu7x:2x2x1
jax: 0.10.0
libtpu: 0.0.40
codegen_flags: <defaults>
</compile_context>

<pallas_src>
import functools

import jax
import jax.numpy as jnp
import numpy as np
from jax.experimental import pallas as pl
from jax.experimental.pallas import tpu as pltpu

# ---------------- configuration (small, consistent with the module) ----------
N_MODELS = 4          # len(models)
N_ACTIONS = 3         # n_actions
IN_DIM = 16           # state feature dim (in_dim)
HIDDEN_DIM = 32       # hidden_dim
N_HIDDEN_LAYERS = 3   # default -> 4 Linear layers total
OUT_DIM = N_MODELS    # out_dim must equal n_models for the weighted sum
MEMORY = 2            # state sequence length; forward uses state[:, -1]
BATCH = 2
N_LAYERS = N_HIDDEN_LAYERS + 1
LANES = 128           # lane-dense width for every padded operand
SUBLANES = 8          # f32 sublane tile (batch rows padded to a multiple)


# ---------------------------- Pallas kernel ----------------------------------
def _fusion_kernel(n_layers, n_mask_lanes, io_ref, w_ref, out_ref):
    # io_ref : (2, 8, 128) f32  row 0 = augmented state_preds (ones-lane at d_in)
    #                           row 1 = flattened pred_actions (lanes 0..M*A-1)
    # w_ref  : (n_layers+1, 128, 128) bf16 packed layer blocks + collect matrix S
    h = io_ref[0]                        # (8, 128) f32
    pa = io_ref[1]                       # (8, 128) f32

    # MLP: biases folded via the propagated ones-lane -> one MXU matmul per
    # layer.  Last layer has the replicate matrix R and the 1/1000 temperature
    # folded in, so it emits logits/1000 replicated across each model's
    # n_actions lanes (lanes >= n_mask_lanes are exactly 0).
    for l in range(n_layers):            # static unroll (4 iterations)
        h = jnp.dot(h.astype(jnp.bfloat16), w_ref[l],
                    preferred_element_type=jnp.float32)
        if l < n_layers - 1:
            h = jnp.maximum(h, 0.0)

    # masked softmax over the first n_models*n_actions lanes; no max-subtract
    # needed since |logits|/1000 cannot overflow exp.
    lane = jax.lax.broadcasted_iota(jnp.int32, h.shape, 1)
    e = jnp.where(lane < n_mask_lanes, jnp.exp(h), 0.0)
    attn_rep = e * pl.reciprocal(jnp.sum(e, axis=-1, keepdims=True), approx=True)

    # weighted_sum[b, a] = sum_m attn[b, m] * pred_actions[b, m, a]
    # attn_rep already equals attn/n_actions replicated per action lane; S is
    # scaled by n_actions at pack time to undo the replication.  Keep this
    # operand f32 (bf16 rounding here would cost ~1e-3 absolute output error).
    out_ref[...] = jnp.dot(attn_rep * pa, w_ref[n_layers].astype(jnp.float32),
                           preferred_element_type=jnp.float32)


def fusion_forward_pallas(state_preds, pred_actions, wslab,
                          n_models=N_MODELS, n_actions=N_ACTIONS,
                          n_layers=N_LAYERS):
    """state_preds : (B, d_in) f32   (d_in = IN_DIM + n_models*n_actions)
       pred_actions: (B, n_models, n_actions) f32
       wslab       : (n_layers+1, 128, 128) bf16 packed weights (pack_weights)
       returns weighted_sum: (B, n_actions) f32"""
    b, d_in = state_preds.shape
    assert d_in + 1 <= LANES and n_models * n_actions <= LANES
    b_pad = ((b + SUBLANES - 1) // SUBLANES) * SUBLANES   # full sublane tiles

    # single lane-dense input buffer: row 0 = x (with ones lane), row 1 = pa_flat
    # (kept f32: row 0 is cast to bf16 at the dot; row 1 must stay f32 for the
    #  attention-weighted sum's accuracy; the extra DMA is ~4 KiB)
    io = jnp.zeros((2, b_pad, LANES), jnp.float32)
    io = io.at[0, :b, :d_in].set(state_preds)
    io = io.at[0, :b, d_in].set(1.0)                      # ones-lane (bias fold)
    io = io.at[1, :b, :n_models * n_actions].set(pred_actions.reshape(b, -1))

    grid = (b_pad // SUBLANES,)
    n_blk = n_layers + 1
    out_pad = pl.pallas_call(
        functools.partial(_fusion_kernel, n_layers, n_models * n_actions),
        out_shape=jax.ShapeDtypeStruct((b_pad, LANES), jnp.float32),
        grid=grid,
        in_specs=[
            pl.BlockSpec((2, SUBLANES, LANES), lambda i: (0, i, 0)),
            # constant weight slab: same block every step -> stays resident
            pl.BlockSpec((n_blk, LANES, LANES), lambda i: (0, 0, 0)),
        ],
        out_specs=pl.BlockSpec((SUBLANES, LANES), lambda i: (i, 0)),
        compiler_params=pltpu.CompilerParams(
            dimension_semantics=("parallel",)),
        cost_estimate=pl.CostEstimate(
            flops=int(grid[0] * n_blk * 2 * SUBLANES * LANES * LANES),
            transcendentals=int(grid[0] * SUBLANES * LANES),
            bytes_accessed=int(wslab.size * 2 + io.size * 4
                               + b_pad * LANES * 4)),
    )(io, wslab)
    return out_pad[:b, :n_actions]                        # lane-dense -> real


# ------------------------- parameter construction ----------------------------
def init_params(key):
    d_in = IN_DIM + N_MODELS * N_ACTIONS
    dims = [d_in] + [HIDDEN_DIM] * N_HIDDEN_LAYERS + [OUT_DIM]
    params = {}
    for i in range(N_LAYERS):
        key, kw, kb = jax.random.split(key, 3)
        bound = 1.0 / np.sqrt(dims[i])
        params[f"w{i+1}"] = jax.random.uniform(
            kw, (dims[i], dims[i + 1]), jnp.float32, -bound, bound)
        params[f"b{i+1}"] = jax.random.uniform(
            kb, (1, dims[i + 1]), jnp.float32, -bound, bound)
    return params


def pack_weights(params, d_in=IN_DIM + N_MODELS * N_ACTIONS, hidden=HIDDEN_DIM,
                 n_models=N_MODELS, n_actions=N_ACTIONS, n_layers=N_LAYERS):
    """Pack all layers (bias rows + ones-lane regen), fold the replicate matrix
    R and the 1/1000 temperature into the last layer, and append the scaled
    collect matrix S -> one (n_layers+1, 128, 128) lane-dense bf16 slab."""
    assert hidden + 1 <= LANES and d_in + 1 <= LANES
    assert n_models * n_actions <= LANES
    slab = np.zeros((n_layers + 1, LANES, LANES), np.float32)

    dims_in = [d_in] + [hidden] * (n_layers - 1)
    dims_out = [hidden] * (n_layers - 1) + [n_models]
    ones_lane_in = d_in                       # lane carrying 1.0 into layer 0
    for l in range(n_layers):
        w = np.asarray(params[f"w{l+1}"], np.float32)           # (fi, fo)
        b_vec = np.asarray(params[f"b{l+1}"], np.float32).reshape(-1)
        fi, fo = dims_in[l], dims_out[l]
        # the previous layer's ones-lane column must land on this bias row
        assert ones_lane_in == fi, "ones-lane / bias-row mismatch"
        slab[l, :fi, :fo] = w
        slab[l, fi, :fo] = b_vec                                # bias row
        if l < n_layers - 1:
            slab[l, fi, hidden] = 1.0                           # regen ones-lane
            ones_lane_in = hidden

    # R replicates logit m across that model's action lanes; S collects lane
    # m*A+a into action a (scaled by A to undo the replicated-softmax /A).
    R = np.zeros((LANES, LANES), np.float32)
    S = np.zeros((LANES, LANES), np.float32)
    for m in range(n_models):
        for a in range(n_actions):
            R[m, m * n_actions + a] = 1.0
            S[m * n_actions + a, a] = float(n_actions)
    slab[n_layers - 1] = (slab[n_layers - 1] @ R) * 1e-3    # fold R + 1/1000
    slab[n_layers] = S
    return jnp.asarray(slab, dtype=jnp.bfloat16)


# --------------------------- plain-JAX glue -----------------------------------
def get_actions(state, model_weights):
    # state: (B, MEMORY, IN_DIM); model_weights: (N_MODELS, IN_DIM, N_ACTIONS)
    last = state[:, -1]                                      # (B, IN_DIM)
    return jnp.einsum("bd,mda->bma", last, model_weights)    # (B, M, A)


def format_states_actions(state, pred_actions):
    b = pred_actions.shape[0]
    return jnp.concatenate(
        [pred_actions.reshape((b, -1)), state[:, -1]], axis=-1)


def reference_forward(state_preds, pred_actions, params):
    h = state_preds
    for i in range(1, N_LAYERS):
        h = jnp.maximum(h @ params[f"w{i}"] + params[f"b{i}"], 0.0)
    logits = h @ params[f"w{N_LAYERS}"] + params[f"b{N_LAYERS}"]
    attn = jax.nn.softmax(logits / 1000.0, axis=-1)
    return jnp.sum(attn[:, :, None] * pred_actions, axis=1)


# ------------------------------- main -----------------------------------------
if __name__ == "__main__":
    key = jax.random.PRNGKey(0)
    key, k_state, k_models, k_params = jax.random.split(key, 4)

    state = jax.random.normal(k_state, (BATCH, MEMORY, IN_DIM), jnp.float32)
    model_weights = jax.random.normal(
        k_models, (N_MODELS, IN_DIM, N_ACTIONS), jnp.float32) * 0.1
    params = init_params(k_params)
    wslab = pack_weights(params)

    pred_actions = get_actions(state, model_weights)           # (B, M, A)
    state_preds = format_states_actions(state, pred_actions)   # (B, M*A + IN_DIM)

    out = fusion_forward_pallas(state_preds, pred_actions, wslab)
    out = jax.block_until_ready(out)

    ref = reference_forward(state_preds, pred_actions, params)
    # tolerance covers the bf16 weight packing + EUP approximate reciprocal
    np.testing.assert_allclose(np.asarray(out), np.asarray(ref),
                               rtol=1e-3, atol=1e-3)
    assert out.shape == (BATCH, N_ACTIONS)
    print("KERNEL_OK")
</pallas_src>

<mosaic_0001>
module attributes {stable_mosaic.version = 11 : i64} {
  func.func @_fusion_kernel(%arg0: i32, %arg1: memref<2x8x128xf32, #tpu.memory_space<vmem>>, %arg2: memref<5x128x128xbf16, #tpu.memory_space<vmem>>, %arg3: memref<8x128xf32, #tpu.memory_space<vmem>>) attributes {dimension_semantics = [#tpu.dimension_semantics<parallel>], iteration_bounds = array<i64: 1>, scalar_prefetch = 0 : i64, scratch_operands = 0 : i64, tpu.core_type = #tpu.core_type<tc>, window_params = [{transform_indices = @transform_0, window_bounds = array<i64: 2, 8, 128>}, {pipeline_mode = #tpu.pipeline_mode<synchronous>, transform_indices = @transform_1, window_bounds = array<i64: 5, 128, 128>}, {transform_indices = @transform_2, window_bounds = array<i64: 8, 128>}]} {
    %c0 = arith.constant 0 : index
    %c0_0 = arith.constant 0 : index
    %c0_1 = arith.constant 0 : index
    %0 = vector.load %arg1[%c0, %c0_0, %c0_1] : memref<2x8x128xf32, #tpu.memory_space<vmem>>, vector<1x8x128xf32>
    %1 = vector.shape_cast %0 : vector<1x8x128xf32> to vector<8x128xf32>
    %c1 = arith.constant 1 : index
    %c0_2 = arith.constant 0 : index
    %c0_3 = arith.constant 0 : index
    %2 = vector.load %arg1[%c1, %c0_2, %c0_3] : memref<2x8x128xf32, #tpu.memory_space<vmem>>, vector<1x8x128xf32>
    %3 = vector.shape_cast %2 : vector<1x8x128xf32> to vector<8x128xf32>
    %4 = arith.truncf %1 : vector<8x128xf32> to vector<8x128xbf16>
    %c0_4 = arith.constant 0 : index
    %c0_5 = arith.constant 0 : index
    %c0_6 = arith.constant 0 : index
    %5 = vector.load %arg2[%c0_4, %c0_5, %c0_6] : memref<5x128x128xbf16, #tpu.memory_space<vmem>>, vector<1x128x128xbf16>
    %6 = vector.shape_cast %5 : vector<1x128x128xbf16> to vector<128x128xbf16>
    %cst = arith.constant dense<0.000000e+00> : vector<8x128xf32>
    %7 = tpu.matmul %4, %6, %cst {dimension_numbers = #tpu.dot_dimension_numbers<[1], [0], [0], [1], [0, 0, 1, 1], [], []>} : vector<8x128xbf16>, vector<128x128xbf16>, vector<8x128xf32> -> vector<8x128xf32>
    %cst_7 = arith.constant 0.000000e+00 : f32
    %8 = vector.broadcast %cst_7 : f32 to vector<8x128xf32>
    %9 = arith.maximumf %7, %8 : vector<8x128xf32>
    %10 = arith.truncf %9 : vector<8x128xf32> to vector<8x128xbf16>
    %c1_8 = arith.constant 1 : index
    %c0_9 = arith.constant 0 : index
    %c0_10 = arith.constant 0 : index
    %11 = vector.load %arg2[%c1_8, %c0_9, %c0_10] : memref<5x128x128xbf16, #tpu.memory_space<vmem>>, vector<1x128x128xbf16>
    %12 = vector.shape_cast %11 : vector<1x128x128xbf16> to vector<128x128xbf16>
    %cst_11 = arith.constant dense<0.000000e+00> : vector<8x128xf32>
    %13 = tpu.matmul %10, %12, %cst_11 {dimension_numbers = #tpu.dot_dimension_numbers<[1], [0], [0], [1], [0, 0, 1, 1], [], []>} : vector<8x128xbf16>, vector<128x128xbf16>, vector<8x128xf32> -> vector<8x128xf32>
    %cst_12 = arith.constant 0.000000e+00 : f32
    %14 = vector.broadcast %cst_12 : f32 to vector<8x128xf32>
    %15 = arith.maximumf %13, %14 : vector<8x128xf32>
    %16 = arith.truncf %15 : vector<8x128xf32> to vector<8x128xbf16>
    %c2 = arith.constant 2 : index
    %c0_13 = arith.constant 0 : index
    %c0_14 = arith.constant 0 : index
    %17 = vector.load %arg2[%c2, %c0_13, %c0_14] : memref<5x128x128xbf16, #tpu.memory_space<vmem>>, vector<1x128x128xbf16>
    %18 = vector.shape_cast %17 : vector<1x128x128xbf16> to vector<128x128xbf16>
    %cst_15 = arith.constant dense<0.000000e+00> : vector<8x128xf32>
    %19 = tpu.matmul %16, %18, %cst_15 {dimension_numbers = #tpu.dot_dimension_numbers<[1], [0], [0], [1], [0, 0, 1, 1], [], []>} : vector<8x128xbf16>, vector<128x128xbf16>, vector<8x128xf32> -> vector<8x128xf32>
    %cst_16 = arith.constant 0.000000e+00 : f32
    %20 = vector.broadcast %cst_16 : f32 to vector<8x128xf32>
    %21 = arith.maximumf %19, %20 : vector<8x128xf32>
    %22 = arith.truncf %21 : vector<8x128xf32> to vector<8x128xbf16>
    %c3 = arith.constant 3 : index
    %c0_17 = arith.constant 0 : index
    %c0_18 = arith.constant 0 : index
    %23 = vector.load %arg2[%c3, %c0_17, %c0_18] : memref<5x128x128xbf16, #tpu.memory_space<vmem>>, vector<1x128x128xbf16>
    %24 = vector.shape_cast %23 : vector<1x128x128xbf16> to vector<128x128xbf16>
    %cst_19 = arith.constant dense<0.000000e+00> : vector<8x128xf32>
    %25 = tpu.matmul %22, %24, %cst_19 {dimension_numbers = #tpu.dot_dimension_numbers<[1], [0], [0], [1], [0, 0, 1, 1], [], []>} : vector<8x128xbf16>, vector<128x128xbf16>, vector<8x128xf32> -> vector<8x128xf32>
    %26 = tpu.iota {dimensions = array<i32: 1>} : vector<8x128xi32>
    %c12_i32 = arith.constant 12 : i32
    %27 = vector.broadcast %c12_i32 : i32 to vector<8x128xi32>
    %28 = arith.cmpi slt, %26, %27 : vector<8x128xi32>
    %29 = math.exp %25 : vector<8x128xf32>
    %cst_20 = arith.constant 0.000000e+00 : f32
    %30 = vector.broadcast %cst_20 : f32 to vector<8x128xf32>
    %31 = arith.select %28, %29, %30 : vector<8x128xi1>, vector<8x128xf32>
    %cst_21 = arith.constant dense<0.000000e+00> : vector<8xf32>
    %32 = vector.multi_reduction <add>, %31, %cst_21 [1] : vector<8x128xf32> to vector<8xf32>
    %33 = vector.shape_cast %32 : vector<8xf32> to vector<8x1xf32>
    %34 = tpu.reciprocal %33 {approx = true} : vector<8x1xf32> -> vector<8x1xf32>
    %35 = vector.broadcast %34 : vector<8x1xf32> to vector<8x128xf32>
    %36 = arith.mulf %31, %35 : vector<8x128xf32>
    %37 = arith.mulf %36, %3 : vector<8x128xf32>
    %c4 = arith.constant 4 : index
    %c0_22 = arith.constant 0 : index
    %c0_23 = arith.constant 0 : index
    %38 = vector.load %arg2[%c4, %c0_22, %c0_23] : memref<5x128x128xbf16, #tpu.memory_space<vmem>>, vector<1x128x128xbf16>
    %39 = vector.shape_cast %38 : vector<1x128x128xbf16> to vector<128x128xbf16>
    %40 = arith.extf %39 : vector<128x128xbf16> to vector<128x128xf32>
    %cst_24 = arith.constant dense<0.000000e+00> : vector<8x128xf32>
    %41 = tpu.matmul %37, %40, %cst_24 {dimension_numbers = #tpu.dot_dimension_numbers<[1], [0], [0], [1], [0, 0, 1, 1], [], []>} : vector<8x128xf32>, vector<128x128xf32>, vector<8x128xf32> -> vector<8x128xf32>
    %c0_25 = arith.constant 0 : index
    %c0_26 = arith.constant 0 : index
    %42 = vector.load %arg3[%c0_25, %c0_26] : memref<8x128xf32, #tpu.memory_space<vmem>>, vector<8x128xf32>
    tpu.vector_store %arg3[%c0_25, %c0_26], %41 {strides = array<i32>} : memref<8x128xf32, #tpu.memory_space<vmem>>, vector<8x128xf32>,
    return
  }
  func.func @transform_0(%arg0: i32) -> (i32, i32, i32) {
    %c0_i32 = arith.constant 0 : i32
    %c0_i32_0 = arith.constant 0 : i32
    %c0_i32_1 = arith.constant 0 : i32
    return %c0_i32, %arg0, %c0_i32_0 : i32, i32, i32
  }
  func.func @transform_1(%arg0: i32) -> (i32, i32, i32) {
    %c0_i32 = arith.constant 0 : i32
    %c0_i32_0 = arith.constant 0 : i32
    %c0_i32_1 = arith.constant 0 : i32
    %c0_i32_2 = arith.constant 0 : i32
    return %c0_i32, %c0_i32_0, %c0_i32_1 : i32, i32, i32
  }
  func.func @transform_2(%arg0: i32) -> (i32, i32) {
    %c0_i32 = arith.constant 0 : i32
    %c0_i32_0 = arith.constant 0 : i32
    return %arg0, %c0_i32 : i32, i32
  }
}

</mosaic_0001>

<bundles_post_ra>
// kernel: tpu_custom_call.1
= control target key start
LH: loop header
LB: loop body
LE: loop exit
PB: predicated region body
PF: predicated region fallthrough
CT: control target
= control target key end

     0   :  { %7 = vsyncpa [#allocation3], 0  ;;  %s1085_s0 = inlined_call_operand.hbm [shape: f32[2,8,128], index: 0, kind: input, shape index: {}]   ;;  %s1086_s1 = inlined_call_operand.hbm [shape: bf16[5,128,128], index: 1, kind: input, shape index: {}]   ;;  %s1087_s2 = inlined_call_operand.hbm [shape: f32[8,128], index: 2, kind: output, shape index: {}]  }
   0x1   :  { %8 = vsyncpa [#allocation6], 0 }
   0x2   :  { %9 = vsyncpa [#allocation4], 0  ;;  %s982_s9 = smov [#allocation2]   ;;  %s910_s13 = scalar_lea.hbm %s1085_s0, 256 }
   0x3   :  { %s15_s10 = sshll.u32 %s982_s9, 4  ;;  %p911_p0 = scmp.ne.s32.totalorder %s1085_s0, %s910_s13  ;;  %s16_s10 = int_to_ptr.vmem [resolvable:$true] %s15_s10 }
   0x4   :  { %p914_p1 = scmp.lt.u32.totalorder %s910_s13, %s1085_s0 }
   0x6   :  { %p916_p2 = pnand %p914_p1, %p911_p0 }
   0x8   :  { %919 = shalt.err (!%p916_p2)
}
   0x9   :  { %s920_s18 = scalar_lea.vmem %s16_s10, 256  ;;  %p925_p4 = scmp.lt.s32.totalorder %s16_s10, %s16_s10 }
   0xa   :  { %p921_p3 = scmp.ne.s32.totalorder %s16_s10, %s920_s18  ;;  %p926_p5 = scmp.lt.s32.totalorder %s920_s18, %s920_s18 }
   0xc   :  { %p927_p6 = por %p926_p5, %p925_p4 }
   0xe   :  { %p928_p7 = pnand %p927_p6, %p921_p3 }
  0x10   :  { %931 = shalt.err (!%p928_p7)
}
  0x11   :  { %s983_s19 = smov 128   ;;  %s984_s20 = smov 8  }
  0x12   :  { %21 = dma.hbm_to_vmem [thread:$0]  %s1085_s0, 256, %s16_s10, [#allocation3], %s983_s19, %s983_s19, %s984_s20  }
  0x13   :  { %s985_s23 = smov [#allocation5]   ;;  %s932_s27 = scalar_lea.hbm %s1086_s1, 5120 }
  0x14   :  { %s27_s24 = sshll.u32 %s985_s23, 4  ;;  %p933_p8 = scmp.ne.s32.totalorder %s1086_s1, %s932_s27  ;;  %s28_s24 = int_to_ptr.vmem [resolvable:$true] %s27_s24 }
  0x15   :  { %p936_p9 = scmp.lt.u32.totalorder %s932_s27, %s1086_s1 }
  0x17   :  { %p938_p10 = pnand %p936_p9, %p933_p8 }
  0x19   :  { %941 = shalt.err (!%p938_p10)
}
  0x1a   :  { %s942_s4 = scalar_lea.vmem %s28_s24, 5120  ;;  %p947_p12 = scmp.lt.s32.totalorder %s28_s24, %s28_s24 }
  0x1b   :  { %p943_p11 = scmp.ne.s32.totalorder %s28_s24, %s942_s4  ;;  %p948_p13 = scmp.lt.s32.totalorder %s942_s4, %s942_s4 }
  0x1d   :  { %p949_p0 = por %p948_p13, %p947_p12 }
  0x1f   :  { %p950_p1 = pnand %p949_p0, %p943_p11 }
  0x21   :  { %953 = shalt.err (!%p950_p1)
}
  0x22   :  { %s986_s0 = smov 64   ;;  %s987_s5 = smov 4  }
  0x23   :  { %33 = dma.hbm_to_vmem [thread:$0]  %s1086_s1, 5120, %s28_s24, [#allocation6], %s986_s0, %s986_s0, %s987_s5  }
  0x24   :  { %976 = dma.done.wait [#allocation3], 256  }
  0x25   :  { %977 = vsyncadd [#allocation3], 4294967040 }
  0x26   :  { %978 = dma.done.wait [#allocation6], 5120  }
  0x27   :  { %979 = vsyncadd [#allocation6], 4294962176  ;;  %v988_v0 = vmov 0.0   ;;  %vm989_vm0 = vmmov 0   ;;  %v874_v1 = vld [vmem:[#allocation5] sm:$0xff]   ;;  %v875_v2 = vld [vmem:[#allocation5 + $0x8] sm:$0xff]   ;;  %v470_v63 = vlaneseq }
  0x28   :  { %725 = vmatprep.subr.bf16.mxu0 %v988_v0  ;;  %741 = vmatprep.mubr.msk.bf16.mxu0 %vm989_vm0, %v988_v0  ;;  %v876_v3 = vld [vmem:[#allocation5 + $0x10] sm:$0xff]   ;;  %v882_v4 = vld [vmem:[#allocation5 + $0x40] sm:$0xff]   ;;  %v877_v5 = vld [vmem:[#allocation5 + $0x18] sm:$0xff]   ;;  %v990_v54 = vmov 0.0|0.0   ;;  %s991_s1 = smov [#allocation7]  }
  0x29   :  { %745 = vmatprep.subr.bf16.mxu1 %v988_v0  ;;  %761 = vmatprep.mubr.msk.bf16.mxu1 %vm989_vm0, %v988_v0  ;;  %v883_v6 = vld [vmem:[#allocation5 + $0x48] sm:$0xff]   ;;  %v878_v7 = vld [vmem:[#allocation5 + $0x20] sm:$0xff]   ;;  %v884_v8 = vld [vmem:[#allocation5 + $0x50] sm:$0xff]   ;;  %s591_s8 = sshll.u32 %s991_s1, 4  ;;  %s592_s8 = int_to_ptr.vmem [resolvable:$true] %s591_s8 }
  0x2a   :  { %726 = vmatpush3.bf16.msra.mxu0 %v874_v1  ;;  %746 = vmatpush3.bf16.msra.mxu1 %v882_v4  ;;  %v879_v9 = vld [vmem:[#allocation5 + $0x28] sm:$0xff]   ;;  %v885_v10 = vld [vmem:[#allocation5 + $0x58] sm:$0xff]   ;;  %v880_v11 = vld [vmem:[#allocation5 + $0x30] sm:$0xff]   ;;  %s954_s9 = scalar_lea.vmem %s592_s8, 128  ;;  %p959_p3 = scmp.lt.s32.totalorder %s592_s8, %s592_s8 }
  0x2b   :  { %727 = vmatprep.subr.bf16.mxu0 %v988_v0  ;;  %747 = vmatprep.subr.bf16.mxu1 %v988_v0  ;;  %v886_v12 = vld [vmem:[#allocation5 + $0x60] sm:$0xff]   ;;  %v881_v13 = vld [vmem:[#allocation5 + $0x38] sm:$0xff]   ;;  %v41_v14 = vld [vmem:[#allocation2] sm:$0xff]  ;;  %p955_p2 = scmp.ne.s32.totalorder %s592_s8, %s954_s9  ;;  %p960_p4 = scmp.lt.s32.totalorder %s954_s9, %s954_s9 }
  0x2c   :  { %v887_v15 = vld [vmem:[#allocation5 + $0x68] sm:$0xff]   ;;  %v44_v16 = vpack.c.bf16 %v41_v14, %v41_v14  ;;  %v888_v17 = vld [vmem:[#allocation5 + $0x70] sm:$0xff]   ;;  %v889_v18 = vld [vmem:[#allocation5 + $0x78] sm:$0xff]  }
  0x2d   :  { %v890_v19 = vld [vmem:[#allocation5 + $0x80] sm:$0xff]   ;;  %v891_v20 = vld [vmem:[#allocation5 + $0x88] sm:$0xff]   ;;  %v892_v21 = vld [vmem:[#allocation5 + $0x90] sm:$0xff]   ;;  %p961_p5 = por %p960_p4, %p959_p3 }
  0x2e   :  { %728 = vmatpush3.bf16.msra.mxu0 %v875_v2  ;;  %748 = vmatpush3.bf16.msra.mxu1 %v883_v6  ;;  %v893_v22 = vld [vmem:[#allocation5 + $0x98] sm:$0xff]   ;;  %v894_v23 = vld [vmem:[#allocation5 + $0xa0] sm:$0xff]   ;;  %v895_v24 = vld [vmem:[#allocation5 + $0xa8] sm:$0xff]  }
  0x2f   :  { %729 = vmatprep.subr.bf16.mxu0 %v988_v0  ;;  %749 = vmatprep.subr.bf16.mxu1 %v988_v0  ;;  %v896_v25 = vld [vmem:[#allocation5 + $0xb0] sm:$0xff]   ;;  %v897_v32 = vld [vmem:[#allocation5 + $0xb8] sm:$0xff]   ;;  %v898_v33 = vld [vmem:[#allocation5 + $0xc0] sm:$0xff]   ;;  %p962_p6 = pnand %p961_p5, %p955_p2 }
  0x30   :  { %v899_v34 = vld [vmem:[#allocation5 + $0xc8] sm:$0xff]   ;;  %v900_v35 = vld [vmem:[#allocation5 + $0xd0] sm:$0xff]   ;;  %v901_v36 = vld [vmem:[#allocation5 + $0xd8] sm:$0xff]  }
  0x31   :  { %v902_v37 = vld [vmem:[#allocation5 + $0xe0] sm:$0xff]   ;;  %v903_v38 = vld [vmem:[#allocation5 + $0xe8] sm:$0xff]   ;;  %v904_v39 = vld [vmem:[#allocation5 + $0xf0] sm:$0xff]  }
  0x32   :  { %730 = vmatpush3.bf16.msra.mxu0 %v876_v3  ;;  %750 = vmatpush3.bf16.msra.mxu1 %v884_v8  ;;  %v905_v46 = vld [vmem:[#allocation5 + $0xf8] sm:$0xff]   ;;  %v634_v53 = vld [vmem:[#allocation5 + $0x100] sm:$0xff]   ;;  %v665_v55 = vld [vmem:[#allocation5 + $0x108] sm:$0xff]  }
  0x33   :  { %731 = vmatprep.subr.bf16.mxu0 %v988_v0  ;;  %751 = vmatprep.subr.bf16.mxu1 %v988_v0  ;;  %v666_v56 = vld [vmem:[#allocation5 + $0x110] sm:$0xff]   ;;  %v667_v57 = vld [vmem:[#allocation5 + $0x118] sm:$0xff]   ;;  %v668_v3 = vld [vmem:[#allocation5 + $0x120] sm:$0xff]  }
  0x34   :  { %v669_v4 = vld [vmem:[#allocation5 + $0x128] sm:$0xff]   ;;  %v671_v6 = vld [vmem:[#allocation5 + $0x138] sm:$0xff]  }
  0x36   :  { %732 = vmatpush3.bf16.msra.mxu0 %v877_v5  ;;  %752 = vmatpush3.bf16.msra.mxu1 %v885_v10  ;;  %v670_v5 = vld [vmem:[#allocation5 + $0x130] sm:$0xff]  }
  0x37   :  { %733 = vmatprep.subr.bf16.mxu0 %v988_v0  ;;  %753 = vmatprep.subr.bf16.mxu1 %v988_v0 }
  0x3a   :  { %734 = vmatpush3.bf16.msra.mxu0 %v878_v7  ;;  %754 = vmatpush3.bf16.msra.mxu1 %v886_v12 }
  0x3b   :  { %735 = vmatprep.subr.bf16.mxu0 %v988_v0  ;;  %755 = vmatprep.subr.bf16.mxu1 %v988_v0 }
  0x3e   :  { %736 = vmatpush3.bf16.msra.mxu0 %v879_v9  ;;  %756 = vmatpush3.bf16.msra.mxu1 %v887_v15  ;;  %v43_v9 = vld [vmem:[#allocation2 + $0x8] sm:$0xff] }
  0x3f   :  { %737 = vmatprep.subr.bf16.mxu0 %v988_v0  ;;  %757 = vmatprep.subr.bf16.mxu1 %v988_v0 }
  0x42   :  { %738 = vmatpush3.bf16.msra.mxu0 %v880_v11  ;;  %758 = vmatpush3.bf16.msra.mxu1 %v888_v17 }
  0x43   :  { %739 = vmatprep.subr.bf16.mxu0 %v988_v0  ;;  %759 = vmatprep.subr.bf16.mxu1 %v988_v0 }
  0x46   :  { %740 = vmatpush3.bf16.msra.mxu0 %v881_v13  ;;  %760 = vmatpush3.bf16.msra.mxu1 %v889_v18 }
  0x47   :  { %765 = vmatprep.subr.bf16.mxu0 %v988_v0  ;;  %785 = vmatprep.subr.bf16.mxu1 %v988_v0 }
  0x49   :  { %742 = vmatmul.mubr.bf16.vlgmr.msra.gmra.mrb[0].mxu0 %v44_v16 }
  0x4a   :  { %781 = vmatprep.mubr.msk.bf16.mxu0 %vm989_vm0, %v988_v0  ;;  %766 = vmatpush3.bf16.msra.mxu0 %v890_v19 }
  0x4b   :  { %767 = vmatprep.subr.bf16.mxu0 %v988_v0 }
  0x4e   :  { %768 = vmatpush3.bf16.msra.mxu0 %v891_v20 }
  0x4f   :  { %769 = vmatprep.subr.bf16.mxu0 %v988_v0 }
  0x52   :  { %770 = vmatpush3.bf16.msra.mxu0 %v892_v21 }
  0x53   :  { %771 = vmatprep.subr.bf16.mxu0 %v988_v0 }
  0x56   :  { %772 = vmatpush3.bf16.msra.mxu0 %v893_v22 }
  0x57   :  { %773 = vmatprep.subr.bf16.mxu0 %v988_v0 }
  0x5a   :  { %774 = vmatpush3.bf16.msra.mxu0 %v894_v23 }
  0x5b   :  { %775 = vmatprep.subr.bf16.mxu0 %v988_v0 }
  0x5e   :  { %776 = vmatpush3.bf16.msra.mxu0 %v895_v24 }
  0x5f   :  { %777 = vmatprep.subr.bf16.mxu0 %v988_v0 }
  0x62   :  { %778 = vmatpush3.bf16.msra.mxu0 %v896_v25 }
  0x63   :  { %779 = vmatprep.subr.bf16.mxu0 %v988_v0 }
  0x66   :  { %780 = vmatpush3.bf16.msra.mxu0 %v897_v32 }
  0x67   :  { %840 = vmatprep.subr.bf16.mxu0 %v990_v54 }
 0x11c   :  { %v143_v26 = vpop.f32.mrb[0].mxu0 }
 0x11d   :  { %v149_v27 = vmax.f32 %v143_v26, 0.0  ;;  %v743_v28 = vpop.f32.mrb[1].mxu0 }
 0x11e   :  { %v146_v29 = vpop.f32.mrb[2].mxu0 }
 0x11f   :  { %v150_v30 = vpack.c.bf16 %v149_v27, %v149_v27  ;;  %v744_v31 = vpop.f32.mrb[3].mxu0 }
 0x121   :  { %762 = vmatmul.mubr.bf16.vlgmr.msra.gmra.mrb[0].mxu1 %v150_v30 }
 0x122   :  { %801 = vmatprep.mubr.msk.bf16.mxu1 %vm989_vm0, %v988_v0  ;;  %786 = vmatpush3.bf16.msra.mxu1 %v898_v33 }
 0x123   :  { %787 = vmatprep.subr.bf16.mxu1 %v988_v0 }
 0x126   :  { %788 = vmatpush3.bf16.msra.mxu1 %v899_v34 }
 0x127   :  { %789 = vmatprep.subr.bf16.mxu1 %v988_v0 }
 0x12a   :  { %790 = vmatpush3.bf16.msra.mxu1 %v900_v35 }
 0x12b   :  { %791 = vmatprep.subr.bf16.mxu1 %v988_v0 }
 0x12e   :  { %792 = vmatpush3.bf16.msra.mxu1 %v901_v36 }
 0x12f   :  { %793 = vmatprep.subr.bf16.mxu1 %v988_v0 }
 0x132   :  { %794 = vmatpush3.bf16.msra.mxu1 %v902_v37 }
 0x133   :  { %795 = vmatprep.subr.bf16.mxu1 %v988_v0 }
 0x136   :  { %796 = vmatpush3.bf16.msra.mxu1 %v903_v38 }
 0x137   :  { %797 = vmatprep.subr.bf16.mxu1 %v988_v0 }
 0x13a   :  { %798 = vmatpush3.bf16.msra.mxu1 %v904_v39 }
 0x13b   :  { %799 = vmatprep.subr.bf16.mxu1 %v988_v0 }
 0x13e   :  { %800 = vmatpush3.bf16.msra.mxu1 %v905_v46 }
 0x1f4   :  { %v250_v40 = vpop.f32.mrb[0].mxu1 }
 0x1f5   :  { %v256_v41 = vmax.f32 %v250_v40, 0.0  ;;  %v763_v42 = vpop.f32.mrb[1].mxu1 }
 0x1f6   :  { %v253_v43 = vpop.f32.mrb[2].mxu1 }
 0x1f7   :  { %v257_v44 = vpack.c.bf16 %v256_v41, %v256_v41  ;;  %v764_v45 = vpop.f32.mrb[3].mxu1 }
 0x1f9   :  { %782 = vmatmul.mubr.bf16.vlgmr.msra.gmra.mrb[4].mxu0 %v257_v44 }
 0x1fa   :  { %837 = vmatprep.mubr.msk.f32.mxu0 %vm989_vm0, %v988_v0  ;;  %842 = vmatpush3.bf16.msra.mxu0 %v634_v53  ;;  %v471_v0 = vand.u32 127, %v470_v63 }
 0x1fb   :  { %843 = vmatprep.subr.bf16.mxu0 %v990_v54 }
 0x1fc   :  { %vm472_vm1 = vcmp.lt.s32.totalorder %v471_v0, 12 }
 0x1fe   :  { %845 = vmatpush3.bf16.msra.mxu0 %v665_v55 }
 0x1ff   :  { %846 = vmatprep.subr.bf16.mxu0 %v990_v54 }
 0x202   :  { %848 = vmatpush3.bf16.msra.mxu0 %v666_v56 }
 0x203   :  { %849 = vmatprep.subr.bf16.mxu0 %v990_v54 }
 0x206   :  { %851 = vmatpush3.bf16.msra.mxu0 %v667_v57 }
 0x207   :  { %852 = vmatprep.subr.bf16.mxu0 %v990_v54 }
 0x20a   :  { %854 = vmatpush3.bf16.msra.mxu0 %v668_v3 }
 0x20b   :  { %855 = vmatprep.subr.bf16.mxu0 %v990_v54 }
 0x20e   :  { %857 = vmatpush3.bf16.msra.mxu0 %v669_v4 }
 0x20f   :  { %858 = vmatprep.subr.bf16.mxu0 %v990_v54 }
 0x212   :  { %860 = vmatpush3.bf16.msra.mxu0 %v670_v5 }
 0x213   :  { %861 = vmatprep.subr.bf16.mxu0 %v990_v54 }
 0x216   :  { %863 = vmatpush3.bf16.msra.mxu0 %v671_v6 }
 0x2cc   :  { %v357_v47 = vpop.f32.mrb[4].mxu0 }
 0x2cd   :  { %v363_v48 = vmax.f32 %v357_v47, 0.0  ;;  %v783_v49 = vpop.f32.mrb[5].mxu0 }
 0x2ce   :  { %v360_v50 = vpop.f32.mrb[6].mxu0 }
 0x2cf   :  { %v364_v51 = vpack.c.bf16 %v363_v48, %v363_v48  ;;  %v784_v52 = vpop.f32.mrb[7].mxu0 }
 0x2d1   :  { %802 = vmatmul.mubr.bf16.vlgmr.msra.gmra.mrb[4].mxu1 %v364_v51 }
 0x3a4   :  { %v464_v58 = vpop.f32.mrb[4].mxu1 }
 0x3a5   :  { %v473_v59 = vmul.f32 1.442695, %v464_v58  ;;  %v803_v60 = vpop.f32.mrb[5].mxu1 }
 0x3a6   :  { %v467_v61 = vpop.f32.mrb[6].mxu1 }
 0x3a7   :  { %906 = vpow2.f32 %v473_v59  ;;  %v804_v62 = vpop.f32.mrb[7].mxu1 }
 0x3b1   :  { %v907_v1 = vpop.eup %906 }
 0x3b2   :  { %v475_v2 = vsel %vm472_vm1, %v907_v1, 0.0 }
 0x3b3   :  { %476 = vadd.xlane.f32.xlu0 %v475_v2 }
 0x440   :  { %v477_v7 = vpop.xlane.xlu0 %476 }
 0x441   :  { %908 = vrcp.f32 %v477_v7 }
 0x44b   :  { %v909_v8 = vpop.eup %908 }
 0x44c   :  { %v479_v10 = vmul.f32 %v909_v8, %v475_v2 }
 0x44e   :  { %v480_v11 = vmul.f32 %v479_v10, %v43_v9 }
 0x450   :  { %838 = vmatmul.mubr.f32.vlgmr.msra.gmra.mrb[8].mxu0 %v480_v11 }
 0x523   :  { %v580_v12 = vpop.f32.mrb[8].mxu0 }
 0x524   :  { %584 = vst [vmem:[#allocation7] sm:$0xff] %v580_v12  ;;  %v839_v13 = vpop.f32.mrb[9].mxu0 }
 0x525   :  { %965 = shalt.err (!%p962_p6)
}
 0x526   :  { %s966_s12 = scalar_lea.hbm %s1087_s2, 128 }
 0x527   :  { %p967_p7 = scmp.ne.s32.totalorder %s1087_s2, %s966_s12  ;;  %p970_p8 = scmp.lt.u32.totalorder %s966_s12, %s1087_s2 }
 0x529   :  { %p972_p9 = pnand %p970_p8, %p967_p7 }
 0x52b   :  { %975 = shalt.err (!%p972_p9)
}
 0x52c   :  { %594 = dma.vmem_to_hbm [thread:$0]  %s592_s8, 128, %s1087_s2, [#allocation4]  }
 0x52d   :  { %980 = dma.done.wait [#allocation4], 128  }
 0x52e   :  { %981 = vsyncadd [#allocation4], 4294967168 }
 0x52f   :  { %598 = vsyncpa [#allocation3], 1 }
 0x530   :  { %599 = vsyncpa [#allocation6], 1 }
 0x531   :  { %600 = vsyncpa [#allocation4], 1 }

</bundles_post_ra>
